<compile_context>
chip_gen: v7x
topology: tpu7x:2x2x1
jax: 0.10.0
libtpu: 0.0.40
codegen_flags: <defaults>
</compile_context>

<pallas_src>
import numpy as np

import jax
import jax.numpy as jnp
from jax.experimental import pallas as pl
from jax.experimental.pallas import tpu as pltpu

RESULT_DTYPE = jnp.float32   # result_dtype = 'float32' in the reference


def _round_up(x, m):
    return ((x + m - 1) // m) * m


# ---------------------------------------------------------------------------
# Fused kernel:
#   Y[m_tile] = sum over non-empty (r, n_tile) blocks of  A_blk @ (X_blk @ W_r)
# ---------------------------------------------------------------------------
def _rgcn_block_kernel(br_ref, bn_ref, cnt_ref, a_ref, x_ref, w_ref, y_ref):
    mi = pl.program_id(0)
    b = pl.program_id(1)

    # The f32 output block is VMEM-resident across the reduction axis b:
    # accumulate directly into it (no scratch accumulator, no final copy).
    @pl.when(b == 0)
    def _init():
        y_ref[...] = jnp.zeros_like(y_ref)

    # Skip padded table entries (m-tiles with fewer non-empty blocks);
    # all-zero adjacency blocks never appear in the table at all.
    @pl.when(b < cnt_ref[mi])
    def _accumulate():
        # Fused "stage 1": WX = X_tile @ W_r (bf16 MXU, f32 accumulation),
        # recomputed per block -- free while HBM-bound, and it removes the
        # (R, N, F_out) WX write+re-read round trip through HBM.
        wx = jnp.dot(x_ref[...], w_ref[0],
                     preferred_element_type=jnp.float32).astype(jnp.bfloat16)
        # A arrives as int8 0/1 (half the bytes of bf16); the int8->bf16 cast
        # is VPU work hidden under the block DMA and exact for a 0/1 mask.
        a = a_ref[0].astype(jnp.bfloat16)
        y_ref[...] += jnp.dot(a, wx, preferred_element_type=jnp.float32)


def _build_block_table(blk_nz):
    """blk_nz: (R, n_m, n_n) bool occupancy -> padded per-m-tile block lists."""
    _, n_m, _ = blk_nz.shape
    per_r, per_n, counts = [], [], []
    for mi in range(n_m):
        rs, ns = np.nonzero(blk_nz[:, mi, :])
        per_r.append(rs.astype(np.int32))
        per_n.append(ns.astype(np.int32))
        counts.append(int(rs.size))
    max_b = max(max(counts), 1)
    br = np.zeros((n_m, max_b), np.int32)
    bn = np.zeros((n_m, max_b), np.int32)
    for mi in range(n_m):
        c = counts[mi]
        if c:
            br[mi, :c] = per_r[mi]
            bn[mi, :c] = per_n[mi]
            # Repeat the last valid block index for padded steps so the
            # pipeline does not touch new HBM tiles (compute is masked by cnt).
            br[mi, c:] = per_r[mi][-1]
            bn[mi, c:] = per_n[mi][-1]
    return br, bn, np.asarray(counts, np.int32), max_b


def create_rgcn_tc_kernel(A, W, *, tm_target=256, tn_target=512):
    """One-time format build + kernel build, mirroring the original module's
    cached kernel (create_tensorcores_kernel).

    A: (R, M, N) 0/1 edge mask (any numeric dtype; nonzero = edge).
    W: (R, F_in, F_out) bf16 -- the flat reinterpretation of the PyTorch
       (R, F_out, F_in) parameter, exactly as the TVM kernel's `.view(-1)`
       consumes it (NOT a transpose).

    Returns forward(X) -> Y (M, F_out) float32, jitted, no host sync per call.
    """
    A_np = np.asarray(jax.device_get(A))
    num_rels, M, N = A_np.shape
    _, F_in, F_out = W.shape

    # Tile sizes: small enough that block skipping fires on real heterographs
    # (sweep per graph), while respecting int8 (32, 128) / bf16 (8, 128) layout.
    tm = min(tm_target, _round_up(M, 32))
    tn = min(tn_target, _round_up(N, 128))
    M_pad = _round_up(M, tm)
    N_pad = _round_up(N, tn)
    F_out_p = _round_up(F_out, 128)     # lane-dense output -> unmasked stores
    n_m = M_pad // tm
    n_n = N_pad // tn

    # A as int8 0/1 in HBM: halves the dominant HBM stream of the mem-bound loop.
    A_i8 = np.zeros((num_rels, M_pad, N_pad), np.int8)
    A_i8[:, :M, :N] = (A_np != 0)

    # Block occupancy table (TPU analog of the ELL3D bucketing), built host-side
    # exactly once so the forward itself stays jittable.
    blk_nz = A_i8.reshape(num_rels, n_m, tm, n_n, tn).any(axis=(2, 4))
    br, bn, cnt, max_b = _build_block_table(blk_nz)

    A_dev = jnp.asarray(A_i8)
    br_dev = jnp.asarray(br.reshape(-1), jnp.int32)
    bn_dev = jnp.asarray(bn.reshape(-1), jnp.int32)
    cnt_dev = jnp.asarray(cnt, jnp.int32)
    W_p = W.astype(jnp.bfloat16)
    if F_out_p != F_out:
        W_p = jnp.pad(W_p, ((0, 0), (0, 0), (0, F_out_p - F_out)))

    # Data-dependent index maps driven by the scalar-prefetched block table.
    def a_index(mi, b, br_s, bn_s, cnt_s):
        t = mi * max_b + b
        return (br_s[t], mi, bn_s[t])

    def x_index(mi, b, br_s, bn_s, cnt_s):
        return (bn_s[mi * max_b + b], 0)

    def w_index(mi, b, br_s, bn_s, cnt_s):
        return (br_s[mi * max_b + b], 0, 0)

    def y_index(mi, b, br_s, bn_s, cnt_s):
        return (mi, 0)

    grid_spec = pltpu.PrefetchScalarGridSpec(
        num_scalar_prefetch=3,
        grid=(n_m, max_b),
        in_specs=[
            pl.BlockSpec((1, tm, tn), a_index),          # A_r block (int8 0/1)
            pl.BlockSpec((tn, F_in), x_index),           # X row block
            pl.BlockSpec((1, F_in, F_out_p), w_index),   # W_r
        ],
        out_specs=pl.BlockSpec((tm, F_out_p), y_index),
        # No scratch: the f32 output block itself is the accumulator.
    )

    kernel = pl.pallas_call(
        _rgcn_block_kernel,
        out_shape=jax.ShapeDtypeStruct((M_pad, F_out_p), RESULT_DTYPE),
        grid_spec=grid_spec,
        compiler_params=pltpu.CompilerParams(
            # m-tiles are independent -> candidates for the two v7x TensorCores;
            # the block axis is the data-dependent reduction.
            dimension_semantics=("parallel", "arbitrary")),
    )

    def _forward(X, A_d, br_d, bn_d, cnt_d, W_d):
        X_b = X.astype(jnp.bfloat16)
        if N_pad != N:
            X_b = jnp.pad(X_b, ((0, N_pad - N), (0, 0)))
        y = kernel(br_d, bn_d, cnt_d, A_d, X_b, W_d)
        return y[:M, :F_out]

    fwd = jax.jit(_forward)

    def forward(X):
        return fwd(X, A_dev, br_dev, bn_dev, cnt_dev, W_p)

    return forward


if __name__ == "__main__":
    # Small synthetic heterograph: num_rels relations, M dst nodes, N src nodes.
    num_rels = 3
    M, N = 64, 96          # dst / src node counts
    in_feat, out_feat = 32, 32

    key = jax.random.PRNGKey(0)
    k_w, k_x, k_a = jax.random.split(key, 3)

    # Parameter as in the module: W = nn.Parameter(torch.Tensor(num_rels, out_feat, in_feat))
    W_param = (jax.random.normal(k_w, (num_rels, out_feat, in_feat), jnp.float32)
               * 0.1)
    # The TVM kernel consumes W.half().view(-1) reinterpreted as (R, F_in, F_out):
    W_kernel = W_param.reshape(num_rels, in_feat, out_feat).astype(jnp.bfloat16)

    # Node features (dropout p=0.0 -> identity).
    X = jax.random.normal(k_x, (N, in_feat), jnp.float32).astype(jnp.bfloat16)

    # Synthetic per-relation edge masks (1.0 where an edge exists), ~10% density.
    A = (jax.random.uniform(k_a, (num_rels, M, N)) < 0.1).astype(jnp.bfloat16)

    # One-time format + kernel build (mirrors the module's cached_kernel).
    forward = create_rgcn_tc_kernel(A, W_kernel)

    Y = jax.block_until_ready(forward(X))
    Y = jax.block_until_ready(forward(X))   # second call: jit/format cache hit

    # Plain-JAX reference with the same quantization (bf16 WX, 0/1 mask, f32 accum).
    wx_ref = jnp.einsum("nf,rfo->rno", X.astype(jnp.float32),
                        W_kernel.astype(jnp.float32)).astype(jnp.bfloat16)
    Y_ref = jnp.einsum("rmn,rno->mo", A.astype(jnp.float32),
                       wx_ref.astype(jnp.float32))

    assert Y.shape == (M, out_feat) and Y.dtype == RESULT_DTYPE
    assert jnp.allclose(Y, Y_ref, rtol=2e-2, atol=2e-2), "mismatch vs reference"

    print("KERNEL_OK")
</pallas_src>

<mosaic_0001>
module attributes {stable_mosaic.version = 11 : i64} {
  func.func @_rgcn_block_kernel(%arg0: i32, %arg1: i32, %arg2: memref<3xi32, #tpu.memory_space<smem>>, %arg3: memref<3xi32, #tpu.memory_space<smem>>, %arg4: memref<1xi32, #tpu.memory_space<smem>>, %arg5: memref<1x64x128xi8, #tpu.memory_space<vmem>>, %arg6: memref<128x32xbf16, #tpu.memory_space<vmem>>, %arg7: memref<1x32x128xbf16, #tpu.memory_space<vmem>>, %arg8: memref<64x128xf32, #tpu.memory_space<vmem>>) attributes {dimension_semantics = [#tpu.dimension_semantics<parallel>, #tpu.dimension_semantics<arbitrary>], iteration_bounds = array<i64: 1, 3>, scalar_prefetch = 3 : i64, scratch_operands = 0 : i64, tpu.core_type = #tpu.core_type<tc>, window_params = [{transform_indices = @transform_0, window_bounds = array<i64: 1, 64, 128>}, {transform_indices = @transform_1, window_bounds = array<i64: 128, 32>}, {transform_indices = @transform_2, window_bounds = array<i64: 1, 32, 128>}, {transform_indices = @transform_3, window_bounds = array<i64: 64, 128>}]} {
    %c0_i32 = arith.constant 0 : i32
    %0 = arith.cmpi eq, %arg1, %c0_i32 : i32
    %1 = arith.extui %0 : i1 to i32
    %c0_i32_0 = arith.constant 0 : i32
    %2 = arith.cmpi ne, %1, %c0_i32_0 : i32
    scf.if %2 {
      %cst = arith.constant 0.000000e+00 : f32
      %8 = vector.broadcast %cst : f32 to vector<64x128xf32>
      %c0 = arith.constant 0 : index
      %c0_2 = arith.constant 0 : index
      %9 = vector.load %arg8[%c0, %c0_2] : memref<64x128xf32, #tpu.memory_space<vmem>>, vector<64x128xf32>
      tpu.vector_store %arg8[%c0, %c0_2], %8 {strides = array<i32>} : memref<64x128xf32, #tpu.memory_space<vmem>>, vector<64x128xf32>,
    } else {
    }
    %3 = arith.index_cast %arg0 : i32 to index
    %4 = memref.load %arg4[%3] : memref<1xi32, #tpu.memory_space<smem>>
    %5 = arith.cmpi slt, %arg1, %4 : i32
    %6 = arith.extui %5 : i1 to i32
    %c0_i32_1 = arith.constant 0 : i32
    %7 = arith.cmpi ne, %6, %c0_i32_1 : i32
    scf.if %7 {
      %c0 = arith.constant 0 : index
      %c0_2 = arith.constant 0 : index
      %8 = vector.load %arg6[%c0, %c0_2] : memref<128x32xbf16, #tpu.memory_space<vmem>>, vector<128x32xbf16>
      %c0_3 = arith.constant 0 : index
      %c0_4 = arith.constant 0 : index
      %c0_5 = arith.constant 0 : index
      %9 = vector.load %arg7[%c0_3, %c0_4, %c0_5] : memref<1x32x128xbf16, #tpu.memory_space<vmem>>, vector<1x32x128xbf16>
      %10 = vector.shape_cast %9 : vector<1x32x128xbf16> to vector<32x128xbf16>
      %cst = arith.constant dense<0.000000e+00> : vector<128x128xf32>
      %11 = tpu.matmul %8, %10, %cst {dimension_numbers = #tpu.dot_dimension_numbers<[1], [0], [0], [1], [0, 0, 1, 1], [], []>} : vector<128x32xbf16>, vector<32x128xbf16>, vector<128x128xf32> -> vector<128x128xf32>
      %12 = arith.truncf %11 : vector<128x128xf32> to vector<128x128xbf16>
      %c0_6 = arith.constant 0 : index
      %c0_7 = arith.constant 0 : index
      %c0_8 = arith.constant 0 : index
      %13 = vector.load %arg5[%c0_6, %c0_7, %c0_8] : memref<1x64x128xi8, #tpu.memory_space<vmem>>, vector<1x64x128xi8>
      %14 = vector.shape_cast %13 : vector<1x64x128xi8> to vector<64x128xi8>
      %15 = arith.sitofp %14 : vector<64x128xi8> to vector<64x128xbf16>
      %c0_9 = arith.constant 0 : index
      %c0_10 = arith.constant 0 : index
      %16 = vector.load %arg8[%c0_9, %c0_10] : memref<64x128xf32, #tpu.memory_space<vmem>>, vector<64x128xf32>
      %cst_11 = arith.constant dense<0.000000e+00> : vector<64x128xf32>
      %17 = tpu.matmul %15, %12, %cst_11 {dimension_numbers = #tpu.dot_dimension_numbers<[1], [0], [0], [1], [0, 0, 1, 1], [], []>} : vector<64x128xbf16>, vector<128x128xbf16>, vector<64x128xf32> -> vector<64x128xf32>
      %18 = arith.addf %16, %17 : vector<64x128xf32>
      %c0_12 = arith.constant 0 : index
      %c0_13 = arith.constant 0 : index
      %19 = vector.load %arg8[%c0_12, %c0_13] : memref<64x128xf32, #tpu.memory_space<vmem>>, vector<64x128xf32>
      tpu.vector_store %arg8[%c0_12, %c0_13], %18 {strides = array<i32>} : memref<64x128xf32, #tpu.memory_space<vmem>>, vector<64x128xf32>,
    } else {
    }
    return
  }
  func.func @transform_0(%arg0: i32, %arg1: i32, %arg2: memref<3xi32, #tpu.memory_space<smem>>, %arg3: memref<3xi32, #tpu.memory_space<smem>>, %arg4: memref<1xi32, #tpu.memory_space<smem>>) -> (i32, i32, i32) {
    %c3_i32 = arith.constant 3 : i32
    %0 = arith.muli %arg0, %c3_i32 : i32
    %1 = arith.addi %0, %arg1 : i32
    %2 = arith.index_cast %1 : i32 to index
    %3 = memref.load %arg2[%2] : memref<3xi32, #tpu.memory_space<smem>>
    %4 = arith.index_cast %1 : i32 to index
    %5 = memref.load %arg3[%4] : memref<3xi32, #tpu.memory_space<smem>>
    %c0_i32 = arith.constant 0 : i32
    return %3, %arg0, %5 : i32, i32, i32
  }
  func.func @transform_1(%arg0: i32, %arg1: i32, %arg2: memref<3xi32, #tpu.memory_space<smem>>, %arg3: memref<3xi32, #tpu.memory_space<smem>>, %arg4: memref<1xi32, #tpu.memory_space<smem>>) -> (i32, i32) {
    %c3_i32 = arith.constant 3 : i32
    %0 = arith.muli %arg0, %c3_i32 : i32
    %1 = arith.addi %0, %arg1 : i32
    %2 = arith.index_cast %1 : i32 to index
    %3 = memref.load %arg3[%2] : memref<3xi32, #tpu.memory_space<smem>>
    %c0_i32 = arith.constant 0 : i32
    %c0_i32_0 = arith.constant 0 : i32
    return %3, %c0_i32 : i32, i32
  }
  func.func @transform_2(%arg0: i32, %arg1: i32, %arg2: memref<3xi32, #tpu.memory_space<smem>>, %arg3: memref<3xi32, #tpu.memory_space<smem>>, %arg4: memref<1xi32, #tpu.memory_space<smem>>) -> (i32, i32, i32) {
    %c3_i32 = arith.constant 3 : i32
    %0 = arith.muli %arg0, %c3_i32 : i32
    %1 = arith.addi %0, %arg1 : i32
    %2 = arith.index_cast %1 : i32 to index
    %3 = memref.load %arg2[%2] : memref<3xi32, #tpu.memory_space<smem>>
    %c0_i32 = arith.constant 0 : i32
    %c0_i32_0 = arith.constant 0 : i32
    %c0_i32_1 = arith.constant 0 : i32
    return %3, %c0_i32, %c0_i32_0 : i32, i32, i32
  }
  func.func @transform_3(%arg0: i32, %arg1: i32, %arg2: memref<3xi32, #tpu.memory_space<smem>>, %arg3: memref<3xi32, #tpu.memory_space<smem>>, %arg4: memref<1xi32, #tpu.memory_space<smem>>) -> (i32, i32) {
    %c0_i32 = arith.constant 0 : i32
    %c0_i32_0 = arith.constant 0 : i32
    return %arg0, %c0_i32 : i32, i32
  }
}

</mosaic_0001>

<bundles_post_ra>
// kernel: _forward.1
= control target key start
LH: loop header
LB: loop body
LE: loop exit
PB: predicated region body
PF: predicated region fallthrough
CT: control target
= control target key end

     0   :  { %s1120_s0 = inlined_call_operand.vmem [shape: s32[3], index: 0, kind: input, shape index: {}]   ;;  %s1121_s3 = inlined_call_operand.vmem [shape: s8[3,64,128], index: 3, kind: input, shape index: {}]   ;;  %s1122_s4 = inlined_call_operand.vmem [shape: bf16[128,32], index: 4, kind: input, shape index: {}]   ;;  %s1123_s5 = inlined_call_operand.vmem [shape: bf16[3,32,128], index: 5, kind: input, shape index: {}]   ;;  %s1124_s6 = inlined_call_operand.vmem [shape: f32[64,128], index: 6, kind: output, shape index: {}]   ;;  %s1125_s1 = inlined_call_operand.vmem [shape: s32[3], index: 1, kind: input, shape index: {}]   ;;  %s1126_s2 = inlined_call_operand.<no memory space> [shape: s32[1], index: 2, kind: input, shape index: {}]  }
   0x1   :  { %s11_s23 = sshll.u32 %s1120_s0, 4  ;;  %s15_s26 = sshll.u32 %s1125_s1, 4  ;;  %s12_s23 = int_to_ptr.vmem [resolvable:$true] %s11_s23  ;;  %s16_s26 = int_to_ptr.vmem [resolvable:$true] %s15_s26 }
   0x2   :  { %s885_s27 = scalar_lea.vmem %s12_s23, 16  ;;  %p890_p1 = scmp.lt.s32.totalorder %s12_s23, %s12_s23 }
   0x3   :  { %p886_p0 = scmp.ne.s32.totalorder %s12_s23, %s885_s27  ;;  %p891_p2 = scmp.lt.s32.totalorder %s885_s27, %s885_s27 }
   0x5   :  { %p892_p3 = por %p891_p2, %p890_p1 }
   0x7   :  { %p893_p4 = pnand %p892_p3, %p886_p0 }
   0x9   :  { %896 = shalt.err (!%p893_p4)  }
   0xa   :  { %s935_s28 = smov [#allocation3]   ;;  %s897_s29 = scalar_lea.vmem %s16_s26, 16 }
   0xb   :  { %14 = dma.vmem_to_smem %s12_s23, 16, %s935_s28, [#allocation2] }
   0xc   :  { %p898_p5 = scmp.ne.s32.totalorder %s16_s26, %s897_s29  ;;  %p902_p6 = scmp.lt.s32.totalorder %s16_s26, %s16_s26 }
   0xd   :  { %p903_p7 = scmp.lt.s32.totalorder %s897_s29, %s897_s29 }
   0xf   :  { %p904_p8 = por %p903_p7, %p902_p6 }
  0x11   :  { %p905_p9 = pnand %p904_p8, %p898_p5 }
  0x13   :  { %908 = shalt.err (!%p905_p9)  }
  0x14   :  { %s936_s0 = smov [#allocation4]   ;;  %19 = sst [smem:[#allocation5]] %s1126_s2 }
  0x15   :  { %18 = dma.vmem_to_smem %s16_s26, 16, %s936_s0, [#allocation2] }
  0x16   :  { %921 = dma.done.wait [#allocation2], 32 }
  0x17   :  { %922 = vsyncadd [#allocation2], 4294967264 }
  0x18   :  { %21 = sfence }
  0x19   :  { %s982_s7 = smov 0   ;;  %s984_s8 = smov 0  }
  0x1a   :  { %s986_s9 = smov 0  }
  0x1b LB: > { %s36_s2 = sadd.s32 1, %s929_s8  ;;  %p750_p10 = scmp.ge.s32.totalorder %s933_s9, 1  ;;  %s933_s9 = sphi %s986_s9, %s27_s9   ;;  %s929_s8 = sphi %s984_s8, %s1128_s8   ;;  %s925_s7 = sphi %s982_s7, %s1127_s7  }
  0x1c   : > { %p37_p11 = scmp.ge.s32.totalorder %s36_s2, 3  ;;  %p236_p12 = scmp.lt.s32.totalorder %s933_s9, 4 }
  0x1e   : > { %s1130_s2 = smov (%p37_p11, %s36_s2), 0  ;;  %p237_p13 = pnand %p750_p10, %p236_p12 }
  0x1f   : > { %s289_s10 = sld [smem:[#allocation3 + %s925_s7]] (!%p237_p13)  ;;  %p757_p4 = scmp.ne.s32.totalorder (!%p237_p13), %s925_s7, 0 }
  0x20   : > { %240 = sbr.rel (%p237_p13) target bundleno = 544 (0x220), region = 32  ;;  %s290_s11 = sld [smem:[#allocation4 + %s925_s7]] (!%p237_p13) }
  0x21   : > { %s310_s12 = sld [smem:[#allocation4 + %s925_s7]] (!%p237_p13) }
  0x22   : > { %s322_s13 = sld [smem:[#allocation3 + %s925_s7]] (!%p237_p13) }
  0x25   : > { %p292_p0 = scmp.lt.s32.totalorder (!%p237_p13), %s289_s10, 2 }
  0x26   : > { %p296_p1 = scmp.lt.s32.totalorder (!%p237_p13), %s290_s11, 0 }
  0x27   : > { %s753_s14 = sshll.u32 %s310_s12, 4  ;;  %s1132_s10 = smov (!%p292_p0, %s289_s10), 2  ;;  %v937_v0 = vmov (!%p757_p4), 0.0  }
  0x28   : > { %s1134_s11 = smov (!%p296_p1, %s290_s11), 0  ;;  %s751_s15 = sshll.u32 %s1132_s10, 1  ;;  %342 = vst [vmem:[%s1124_s6] sm:$0xff] (!%p757_p4), %v937_v0  ;;  %343 = vst [vmem:[%s1124_s6 + $0x8] sm:$0xff] (!%p757_p4), %v937_v0 }
  0x29   : > { %p312_p2 = scmp.lt.s32.totalorder %s753_s14, 15  ;;  %s300_s16 = sadd.s32 %s751_s15, %s1134_s11  ;;  %344 = vst [vmem:[%s1124_s6 + $0x10] sm:$0xff] (!%p757_p4), %v937_v0  ;;  %345 = vst [vmem:[%s1124_s6 + $0x18] sm:$0xff] (!%p757_p4), %v937_v0 }
  0x2a   : > { %p323_p3 = scmp.lt.s32.totalorder %s322_s13, 2  ;;  %s752_s17 = sshll.u32 %s300_s16, 3  ;;  %346 = vst [vmem:[%s1124_s6 + $0x20] sm:$0xff] (!%p757_p4), %v937_v0  ;;  %347 = vst [vmem:[%s1124_s6 + $0x28] sm:$0xff] (!%p757_p4), %v937_v0 }
  0x2b   : > { %s1009_s20 = scalar_lea.vmem %s1121_s3, %s752_s17  ;;  %s1136_s14 = smov (!%p312_p2, %s753_s14), 15  ;;  %348 = vst [vmem:[%s1124_s6 + $0x30] sm:$0xff] (!%p757_p4), %v937_v0  ;;  %349 = vst [vmem:[%s1124_s6 + $0x38] sm:$0xff] (!%p757_p4), %v937_v0 }
  0x2c   : > { %s1138_s13 = smov (!%p323_p3, %s322_s13), 2  ;;  %s754_s21 = sshll.u32 %s1136_s14, 2 }
  0x2d   : > { %s1014_s24 = scalar_lea.vmem %s1122_s4, %s754_s21  ;;  %s781_s25 = sshll.u32 %s1138_s13, 4 }
  0x2e   : > { %s327_s28 = scalar_lea.vmem %s1123_s5, %s781_s25  ;;  %341 = sbr.rel (%p757_p4) target bundleno = 53 (0x35), region = 36 }
  0x35 PF: > { %s350_s23 = sld [smem:[#allocation5]] }
  0x3b   : > { %p758_p5 = scmp.ge.s32.totalorder %s925_s7, %s350_s23 }
  0x3c   : > { %v875_v1 = vld [vmem:[%s327_s28] sm:$0xff] (!%p758_p5)   ;;  %v876_v2 = vld [vmem:[%s327_s28 + $0x8] sm:$0xff] (!%p758_p5)   ;;  %vm427_vm0 = vcmask (!%p758_p5), 261120   ;;  %v879_v5 = vld [vmem:[%s1014_s24 + $0x10] sm:$0xff] (!%p758_p5)  }
  0x3d   : > { %354 = sbr.rel (%p758_p5) target bundleno = 544 (0x220), region = 40  ;;  %804 = vmatprep.subr.bf16.mxu0 (!%p758_p5), %v875_v1  ;;  %v877_v3 = vld [vmem:[%s1014_s24] sm:$0xff] (!%p758_p5)   ;;  %v878_v4 = vld [vmem:[%s1014_s24 + $0x8] sm:$0xff] (!%p758_p5)   ;;  %v880_v6 = vld [vmem:[%s1014_s24 + $0x18] sm:$0xff] (!%p758_p5)  }
  0x3e   : > { %805 = vmatpush3.bf16.msra.mxu0 (!%p758_p5), %v875_v1  ;;  %808 = vmatprep.mubr.msk.bf16.mxu0 (!%p758_p5), %vm427_vm0, %v877_v3  ;;  %v881_v7 = vld [vmem:[%s1014_s24 + $0x20] sm:$0xff] (!%p758_p5)   ;;  %v882_v8 = vld [vmem:[%s1014_s24 + $0x28] sm:$0xff] (!%p758_p5)   ;;  %v883_v9 = vld [vmem:[%s1014_s24 + $0x30] sm:$0xff] (!%p758_p5)  }
  0x3f   : > { %806 = vmatprep.subr.bf16.mxu0 (!%p758_p5), %v876_v2  ;;  %v884_v10 = vld [vmem:[%s1014_s24 + $0x38] sm:$0xff] (!%p758_p5)   ;;  %v557_v11 = vld [vmem:[%s1009_s20] sm:$0xff] (!%p758_p5)  ;;  %v558_v37 = vld [vmem:[%s1009_s20 + $0x8] sm:$0xff] (!%p758_p5) }
  0x40   : > { %v559_v12 = vunpack.c.l.s8.bf16 (!%p758_p5), %v557_v11  ;;  %v560_v38 = vunpack.c.h.s8.bf16 (!%p758_p5), %v557_v11  ;;  %v561_v39 = vunpack.c.l.s8.bf16 (!%p758_p5), %v558_v37  ;;  %v562_v40 = vunpack.c.h.s8.bf16 (!%p758_p5), %v558_v37  ;;  %v565_v41 = vld [vmem:[%s1124_s6 + $0x10] sm:$0xff] (!%p758_p5)  ;;  %v563_v42 = vld [vmem:[%s1124_s6] sm:$0xff] (!%p758_p5)  ;;  %v566_v44 = vld [vmem:[%s1124_s6 + $0x18] sm:$0xff] (!%p758_p5) }
  0x41   : > { %v564_v47 = vld [vmem:[%s1124_s6 + $0x8] sm:$0xff] (!%p758_p5)  ;;  %v569_v53 = vld [vmem:[%s1124_s6 + $0x30] sm:$0xff] (!%p758_p5)  ;;  %v567_v54 = vld [vmem:[%s1124_s6 + $0x20] sm:$0xff] (!%p758_p5) }
  0x42   : > { %807 = vmatpush3.bf16.msra.mxu0 (!%p758_p5), %v876_v2  ;;  %840 = vmatprep.mubr.bf16.mxu1 (!%p758_p5), %v559_v12  ;;  %v570_v56 = vld [vmem:[%s1124_s6 + $0x38] sm:$0xff] (!%p758_p5)  ;;  %v568_v59 = vld [vmem:[%s1124_s6 + $0x28] sm:$0xff] (!%p758_p5) }
  0x45   : > { %809 = vmatmul.mubr.msk.bf16.vlgmr.msra.gmra.mrb[0].mxu0 %vm427_vm0, %v878_v4 }
  0x46   : > { %812 = vmatprep.mubr.msk.bf16.mxu0 %vm427_vm0, %v879_v5 }
  0x4d   : > { %813 = vmatmul.mubr.msk.bf16.gmra.mrb[4].mxu0 %vm427_vm0, %v880_v6 }
  0x4e   : > { %816 = vmatprep.mubr.msk.bf16.mxu0 %vm427_vm0, %v881_v7 }
  0x55   : > { %817 = vmatmul.mubr.msk.bf16.gmra.mrb[8].mxu0 %vm427_vm0, %v882_v8 }
  0x56   : > { %820 = vmatprep.mubr.msk.bf16.mxu0 %vm427_vm0, %v883_v9 }
  0x5d   : > { %821 = vmatmul.mubr.msk.bf16.gmra.mrb[12].mxu0 %vm427_vm0, %v884_v10 }
 0x118   : > { %v810_v13 = vpop.f32.mrb[0].mxu0 }
 0x119   : > { %v486_v14 = vpop.f32.mrb[1].mxu0 }
 0x11a   : > { %v811_v15 = vpop.f32.mrb[2].mxu0 }
 0x11b   : > { %v550_v16 = vpack.c.bf16 %v811_v15, %v810_v13  ;;  %v489_v17 = vpop.f32.mrb[3].mxu0 }
 0x11c   : > { %v549_v18 = vpack.c.bf16 %v489_v17, %v486_v14 }
 0x11e   : > { %824 = vmatprep.subr.bf16.mxu1 %v549_v18 }
 0x11f   : > { %825 = vmatpush3.bf16.msra.mxu1 %v549_v18 }
 0x120   : > { %v814_v19 = vpop.f32.mrb[4].mxu0  ;;  %826 = vmatprep.subr.bf16.mxu1 %v550_v16 }
 0x121   : > { %v502_v20 = vpop.f32.mrb[5].mxu0 }
 0x122   : > { %v815_v21 = vpop.f32.mrb[6].mxu0 }
 0x123   : > { %v552_v22 = vpack.c.bf16 %v815_v21, %v814_v19  ;;  %v505_v23 = vpop.f32.mrb[7].mxu0  ;;  %827 = vmatpush3.bf16.msra.mxu1 %v550_v16 }
 0x124   : > { %v551_v24 = vpack.c.bf16 %v505_v23, %v502_v20 }
 0x126   : > { %828 = vmatprep.subr.bf16.mxu1 %v551_v24 }
 0x127   : > { %829 = vmatpush3.bf16.msra.mxu1 %v551_v24 }
 0x128   : > { %v818_v25 = vpop.f32.mrb[8].mxu0  ;;  %830 = vmatprep.subr.bf16.mxu1 %v552_v22 }
 0x129   : > { %v518_v26 = vpop.f32.mrb[9].mxu0 }
 0x12a   : > { %v819_v27 = vpop.f32.mrb[10].mxu0 }
 0x12b   : > { %v554_v28 = vpack.c.bf16 %v819_v27, %v818_v25  ;;  %v521_v29 = vpop.f32.mrb[11].mxu0  ;;  %831 = vmatpush3.bf16.msra.mxu1 %v552_v22 }
 0x12c   : > { %v553_v30 = vpack.c.bf16 %v521_v29, %v518_v26 }
 0x12e   : > { %832 = vmatprep.subr.bf16.mxu1 %v553_v30 }
 0x12f   : > { %833 = vmatpush3.bf16.msra.mxu1 %v553_v30 }
 0x130   : > { %v822_v31 = vpop.f32.mrb[12].mxu0  ;;  %834 = vmatprep.subr.bf16.mxu1 %v554_v28 }
 0x131   : > { %v534_v32 = vpop.f32.mrb[13].mxu0 }
 0x132   : > { %v823_v33 = vpop.f32.mrb[14].mxu0 }
 0x133   : > { %v556_v34 = vpack.c.bf16 %v823_v33, %v822_v31  ;;  %v537_v35 = vpop.f32.mrb[15].mxu0  ;;  %835 = vmatpush3.bf16.msra.mxu1 %v554_v28 }
 0x134   : > { %v555_v36 = vpack.c.bf16 %v537_v35, %v534_v32 }
 0x136   : > { %836 = vmatprep.subr.bf16.mxu1 %v555_v36 }
 0x137   : > { %837 = vmatpush3.bf16.msra.mxu1 %v555_v36 }
 0x138   : > { %838 = vmatprep.subr.bf16.mxu1 %v556_v34 }
 0x13b   : > { %839 = vmatpush3.bf16.msra.mxu1 %v556_v34 }
 0x13e   : > { %841 = vmatmul.mubr.bf16.vlgmr.msra.gmra.mrb[0].mxu1 %v560_v38 }
 0x13f   : > { %844 = vmatprep.mubr.bf16.mxu1 %v561_v39 }
 0x146   : > { %845 = vmatmul.mubr.bf16.gmra.mrb[4].mxu1 %v562_v40 }
 0x211   : > { %v842_v43 = vpop.f32.mrb[0].mxu1 }
 0x212   : > { %v638_v45 = vadd.f32 %v842_v43, %v565_v41  ;;  %v605_v46 = vpop.f32.mrb[1].mxu1 }
 0x213   : > { %v636_v48 = vadd.f32 %v605_v46, %v563_v42  ;;  %v843_v49 = vpop.f32.mrb[2].mxu1 }
 0x214   : > { %646 = vst [vmem:[%s1124_s6 + $0x10] sm:$0xff] %v638_v45  ;;  %v639_v50 = vadd.f32 %v843_v49, %v566_v44  ;;  %v608_v51 = vpop.f32.mrb[3].mxu1 }
 0x215   : > { %644 = vst [vmem:[%s1124_s6] sm:$0xff] %v636_v48  ;;  %v637_v52 = vadd.f32 %v608_v51, %v564_v47 }
 0x216   : > { %647 = vst [vmem:[%s1124_s6 + $0x18] sm:$0xff] %v639_v50 }
 0x217   : > { %645 = vst [vmem:[%s1124_s6 + $0x8] sm:$0xff] %v637_v52 }
 0x219   : > { %v846_v55 = vpop.f32.mrb[4].mxu1 }
 0x21a   : > { %v642_v57 = vadd.f32 %v846_v55, %v569_v53  ;;  %v621_v58 = vpop.f32.mrb[5].mxu1 }
 0x21b   : > { %v640_v60 = vadd.f32 %v621_v58, %v567_v54  ;;  %v847_v61 = vpop.f32.mrb[6].mxu1 }
 0x21c   : > { %650 = vst [vmem:[%s1124_s6 + $0x30] sm:$0xff] %v642_v57  ;;  %v643_v62 = vadd.f32 %v847_v61, %v570_v56  ;;  %v624_v63 = vpop.f32.mrb[7].mxu1 }
 0x21d   : > { %648 = vst [vmem:[%s1124_s6 + $0x20] sm:$0xff] %v640_v60  ;;  %v641_v0 = vadd.f32 %v624_v63, %v568_v59 }
 0x21e   : > { %651 = vst [vmem:[%s1124_s6 + $0x38] sm:$0xff] %v643_v62 }
 0x21f   : > { %649 = vst [vmem:[%s1124_s6 + $0x28] sm:$0xff] %v641_v0 }
 0x220 PF: > { %s27_s9 = sadd.s32 1, %s933_s9   ;;  %s1127_s7 = smov %s929_s8 }
 0x221   : > { %p24_p6 = scmp.ge.s32.totalorder %s27_s9, 5   ;;  %s1128_s8 = smov %s1130_s2 }
 0x223   :  { %26 = sbr.rel (!%p24_p6) target bundleno = 27 (0x1b), region = 76 }

</bundles_post_ra>
